<compile_context>
chip_gen: v7x
topology: tpu7x:2x2x1
jax: 0.10.0
libtpu: 0.0.40
codegen_flags: <defaults>
</compile_context>

<pallas_src>
import jax
import jax.numpy as jnp
from jax.experimental import pallas as pl
from jax.experimental.pallas import tpu as pltpu


def _round_up(x, m):
    return ((x + m - 1) // m) * m


def _choose_tile_n(N, requested, B):
    """Pick TN: multiple of 128, divides round_up(N,128), keeps >=4 grid pts."""
    np128 = _round_up(N, 128)
    t = min(_round_up(max(requested, 128), 128), np128)
    while t > 128 and (np128 % t) != 0:      # divisor of Np -> no ragged last tile
        t -= 128
    # keep at least ~4 grid points for megacore / v7x 2-TC sharding
    while B * (np128 // t) < 4 and t % 256 == 0:
        t //= 2
    return t, np128


def _points_obj_cls_kernel(x_ref, w1_ref, b1_ref, w2_ref, b2_ref,
                           w3_ref, b3_ref, o_ref):
    # x_ref : (1, Cp, TN) f32   w1/w2 : (Cp, Cp) f32   b1/b2 : (Cp, 1) f32
    # w3    : (1, Cp)  f32      b3    : (1,)  f32 SMEM  o_ref : (1, 1, TN) f32
    x = x_ref[0]                                                   # (Cp, TN)
    h1 = jnp.dot(w1_ref[...], x, preferred_element_type=jnp.float32)
    h1 = jnp.maximum(h1 + b1_ref[...], 0.0)                        # (Cp, TN)
    h2 = jnp.dot(w2_ref[...], h1, preferred_element_type=jnp.float32)
    h2 = jnp.maximum(h2 + b2_ref[...], 0.0)                        # (Cp, TN)
    logits = jnp.dot(w3_ref[...], h2, preferred_element_type=jnp.float32)
    o_ref[0] = logits + b3_ref[0]                                  # (1, TN) lane-dense


def points_obj_cls_forward(seed_features, params, eps=1e-5, tile_n=2048):
    """seed_features: (B, C, N) float32 -> logits (B, 1, N) float32."""
    B, C, N = seed_features.shape
    Cp = max(_round_up(C, 8), 8)             # f32 sublane multiple only (no 128 pad)
    tn, Np = _choose_tile_n(N, tile_n, B)

    # ---- fold eval-mode BatchNorm into the 1x1 convs (host-side glue) ----
    def fold(w, b, gamma, beta, mean, var):
        scale = gamma * jax.lax.rsqrt(var + eps)                   # (C,)
        return w * scale[:, None], (b - mean) * scale + beta       # (C,C),(C,)

    def pad2(a, r, c):
        a = a.astype(jnp.float32)
        if a.shape == (r, c):
            return a
        return jnp.zeros((r, c), jnp.float32).at[:a.shape[0], :a.shape[1]].set(a)

    w1f, b1f = fold(params["w1"], params["b1"], params["g1"], params["be1"],
                    params["rm1"], params["rv1"])
    w2f, b2f = fold(params["w2"], params["b2"], params["g2"], params["be2"],
                    params["rm2"], params["rv2"])

    # Zero padding keeps padded channels exactly 0 through both ReLUs and the
    # padded w3 entries contribute nothing to the logits.
    w1p = pad2(w1f, Cp, Cp)                                        # (Cp, Cp)
    w2p = pad2(w2f, Cp, Cp)                                        # (Cp, Cp)
    w3p = pad2(params["w3"], 1, Cp)                                # (1, Cp)
    b1p = pad2(b1f[:, None], Cp, 1)                                # (Cp, 1)
    b2p = pad2(b2f[:, None], Cp, 1)                                # (Cp, 1)
    b3 = params["b3"].reshape(1).astype(jnp.float32)               # (1,) SMEM

    # NCW-native f32 input; pad only when strictly necessary (no-op copy avoided).
    x = seed_features.astype(jnp.float32)
    if Cp != C or Np != N:
        x = jnp.pad(x, ((0, 0), (0, Cp - C), (0, Np - N)))

    flops = B * Np * (4 * Cp * Cp + 2 * Cp)
    bytes_accessed = 4 * (B * Cp * Np + B * Np + 2 * Cp * Cp + 3 * Cp + 1)

    out = pl.pallas_call(
        _points_obj_cls_kernel,
        out_shape=jax.ShapeDtypeStruct((B, 1, Np), jnp.float32),
        grid_spec=pltpu.PrefetchScalarGridSpec(
            num_scalar_prefetch=0,
            grid=(B, Np // tn),
            in_specs=[
                pl.BlockSpec((1, Cp, tn), lambda b, n: (b, 0, n)),        # x
                pl.BlockSpec((Cp, Cp), lambda b, n: (0, 0)),              # w1
                pl.BlockSpec((Cp, 1), lambda b, n: (0, 0)),               # b1
                pl.BlockSpec((Cp, Cp), lambda b, n: (0, 0)),              # w2
                pl.BlockSpec((Cp, 1), lambda b, n: (0, 0)),               # b2
                pl.BlockSpec((1, Cp), lambda b, n: (0, 0)),               # w3
                pl.BlockSpec(memory_space=pltpu.MemorySpace.SMEM),        # b3
            ],
            out_specs=pl.BlockSpec((1, 1, tn), lambda b, n: (b, 0, n)),
        ),
        compiler_params=pltpu.CompilerParams(
            dimension_semantics=("parallel", "parallel")),
        cost_estimate=pl.CostEstimate(flops=int(flops), transcendentals=0,
                                      bytes_accessed=int(bytes_accessed)),
    )(x, w1p, b1p, w2p, b2p, w3p, b3)

    # Padded-N lanes hold relu(bias) garbage internally; slice them off here.
    return out[:, :, :N] if Np != N else out                       # (B, 1, N)


def _reference_forward(seed_features, params, eps=1e-5):
    """Pure-JAX f32 reference, mirroring PyTorch (eval-mode BN)."""
    x = seed_features                                              # (B, C, N)

    def conv1x1(x, w, b):                                          # w: (Co, Ci)
        return jnp.einsum("oc,bcn->bon", w, x) + b[None, :, None]

    def bn(x, gamma, beta, mean, var):
        return (x - mean[None, :, None]) / jnp.sqrt(var + eps)[None, :, None] \
               * gamma[None, :, None] + beta[None, :, None]

    net = jax.nn.relu(bn(conv1x1(x, params["w1"], params["b1"]),
                         params["g1"], params["be1"],
                         params["rm1"], params["rv1"]))
    net = jax.nn.relu(bn(conv1x1(net, params["w2"], params["b2"]),
                         params["g2"], params["be2"],
                         params["rm2"], params["rv2"]))
    return conv1x1(net, params["w3"], params["b3"])


def init_params(key, C):
    ks = jax.random.split(key, 12)
    p = {
        "w1": jax.random.normal(ks[0], (C, C), jnp.float32) * 0.1,
        "b1": jax.random.normal(ks[1], (C,), jnp.float32) * 0.1,
        "g1": 1.0 + 0.1 * jax.random.normal(ks[2], (C,), jnp.float32),
        "be1": 0.1 * jax.random.normal(ks[3], (C,), jnp.float32),
        "rm1": 0.1 * jax.random.normal(ks[4], (C,), jnp.float32),
        "rv1": 1.0 + 0.1 * jax.random.uniform(ks[5], (C,), jnp.float32),
        "w2": jax.random.normal(ks[6], (C, C), jnp.float32) * 0.1,
        "b2": jax.random.normal(ks[7], (C,), jnp.float32) * 0.1,
        "g2": 1.0 + 0.1 * jax.random.normal(ks[8], (C,), jnp.float32),
        "be2": 0.1 * jax.random.normal(ks[9], (C,), jnp.float32),
        "rm2": 0.1 * jax.random.normal(ks[10], (C,), jnp.float32),
        "rv2": 1.0 + 0.1 * jax.random.uniform(ks[11], (C,), jnp.float32),
    }
    k3w, k3b = jax.random.split(ks[0])
    p["w3"] = jax.random.normal(k3w, (1, C), jnp.float32) * 0.1
    p["b3"] = jax.random.normal(k3b, (1,), jnp.float32) * 0.1
    return p


if __name__ == "__main__":
    B, C, N = 2, 32, 256   # batch, seed_feature_dim, num_seed (small demo)
    key = jax.random.PRNGKey(0)
    kx, kp = jax.random.split(key)
    seed_features = jax.random.normal(kx, (B, C, N), jnp.float32)
    params = init_params(kp, C)

    # Default tile_n=2048 collapses to 128 here (keeps >=4 grid points at
    # this tiny N), exercising the (B, N/TN) grid path.
    logits = points_obj_cls_forward(seed_features, params)
    logits = jax.block_until_ready(logits)

    ref = _reference_forward(seed_features, params)
    assert logits.shape == (B, 1, N), logits.shape
    err = float(jnp.max(jnp.abs(logits - ref)))
    assert err < 2e-2, err
    print("KERNEL_OK")
</pallas_src>

<mosaic_0001>
module attributes {stable_mosaic.version = 11 : i64} {
  func.func @_points_obj_cls_kernel(%arg0: i32, %arg1: i32, %arg2: memref<1x32x128xf32, #tpu.memory_space<vmem>>, %arg3: memref<32x32xf32, #tpu.memory_space<vmem>>, %arg4: memref<32x1xf32, #tpu.memory_space<vmem>>, %arg5: memref<32x32xf32, #tpu.memory_space<vmem>>, %arg6: memref<32x1xf32, #tpu.memory_space<vmem>>, %arg7: memref<1x32xf32, #tpu.memory_space<vmem>>, %arg8: memref<1xf32, #tpu.memory_space<smem>>, %arg9: memref<1x1x128xf32, #tpu.memory_space<vmem>>) attributes {dimension_semantics = [#tpu.dimension_semantics<parallel>, #tpu.dimension_semantics<parallel>], iteration_bounds = array<i64: 2, 2>, scalar_prefetch = 0 : i64, scratch_operands = 0 : i64, tpu.core_type = #tpu.core_type<tc>, window_params = [{transform_indices = @transform_0, window_bounds = array<i64: 1, 32, 128>}, {pipeline_mode = #tpu.pipeline_mode<synchronous>, transform_indices = @transform_1, window_bounds = array<i64: 32, 32>}, {pipeline_mode = #tpu.pipeline_mode<synchronous>, transform_indices = @transform_2, window_bounds = array<i64: 32, 1>}, {pipeline_mode = #tpu.pipeline_mode<synchronous>, transform_indices = @transform_3, window_bounds = array<i64: 32, 32>}, {pipeline_mode = #tpu.pipeline_mode<synchronous>, transform_indices = @transform_4, window_bounds = array<i64: 32, 1>}, {pipeline_mode = #tpu.pipeline_mode<synchronous>, transform_indices = @transform_5, window_bounds = array<i64: 1, 32>}, {transform_indices = @transform_6, window_bounds = array<i64: 1>}, {transform_indices = @transform_7, window_bounds = array<i64: 1, 1, 128>}]} {
    %c0 = arith.constant 0 : index
    %c0_0 = arith.constant 0 : index
    %c0_1 = arith.constant 0 : index
    %0 = vector.load %arg2[%c0, %c0_0, %c0_1] : memref<1x32x128xf32, #tpu.memory_space<vmem>>, vector<1x32x128xf32>
    %1 = vector.shape_cast %0 : vector<1x32x128xf32> to vector<32x128xf32>
    %c0_2 = arith.constant 0 : index
    %c0_3 = arith.constant 0 : index
    %2 = vector.load %arg3[%c0_2, %c0_3] : memref<32x32xf32, #tpu.memory_space<vmem>>, vector<32x32xf32>
    %cst = arith.constant dense<0.000000e+00> : vector<32x128xf32>
    %3 = tpu.matmul %2, %1, %cst {dimension_numbers = #tpu.dot_dimension_numbers<[1], [0], [0], [1], [0, 0, 1, 1], [], []>} : vector<32x32xf32>, vector<32x128xf32>, vector<32x128xf32> -> vector<32x128xf32>
    %c0_4 = arith.constant 0 : index
    %c0_5 = arith.constant 0 : index
    %4 = vector.load %arg4[%c0_4, %c0_5] : memref<32x1xf32, #tpu.memory_space<vmem>>, vector<32x1xf32>
    %5 = vector.broadcast %4 : vector<32x1xf32> to vector<32x128xf32>
    %6 = arith.addf %3, %5 : vector<32x128xf32>
    %cst_6 = arith.constant 0.000000e+00 : f32
    %7 = vector.broadcast %cst_6 : f32 to vector<32x128xf32>
    %8 = arith.maximumf %6, %7 : vector<32x128xf32>
    %c0_7 = arith.constant 0 : index
    %c0_8 = arith.constant 0 : index
    %9 = vector.load %arg5[%c0_7, %c0_8] : memref<32x32xf32, #tpu.memory_space<vmem>>, vector<32x32xf32>
    %cst_9 = arith.constant dense<0.000000e+00> : vector<32x128xf32>
    %10 = tpu.matmul %9, %8, %cst_9 {dimension_numbers = #tpu.dot_dimension_numbers<[1], [0], [0], [1], [0, 0, 1, 1], [], []>} : vector<32x32xf32>, vector<32x128xf32>, vector<32x128xf32> -> vector<32x128xf32>
    %c0_10 = arith.constant 0 : index
    %c0_11 = arith.constant 0 : index
    %11 = vector.load %arg6[%c0_10, %c0_11] : memref<32x1xf32, #tpu.memory_space<vmem>>, vector<32x1xf32>
    %12 = vector.broadcast %11 : vector<32x1xf32> to vector<32x128xf32>
    %13 = arith.addf %10, %12 : vector<32x128xf32>
    %cst_12 = arith.constant 0.000000e+00 : f32
    %14 = vector.broadcast %cst_12 : f32 to vector<32x128xf32>
    %15 = arith.maximumf %13, %14 : vector<32x128xf32>
    %c0_13 = arith.constant 0 : index
    %c0_14 = arith.constant 0 : index
    %16 = vector.load %arg7[%c0_13, %c0_14] : memref<1x32xf32, #tpu.memory_space<vmem>>, vector<1x32xf32>
    %cst_15 = arith.constant dense<0.000000e+00> : vector<1x128xf32>
    %17 = tpu.matmul %16, %15, %cst_15 {dimension_numbers = #tpu.dot_dimension_numbers<[1], [0], [0], [1], [0, 0, 1, 1], [], []>} : vector<1x32xf32>, vector<32x128xf32>, vector<1x128xf32> -> vector<1x128xf32>
    %c0_16 = arith.constant 0 : index
    %18 = memref.load %arg8[%c0_16] : memref<1xf32, #tpu.memory_space<smem>>
    %19 = vector.broadcast %18 : f32 to vector<1x128xf32>
    %20 = arith.addf %17, %19 : vector<1x128xf32>
    %c0_17 = arith.constant 0 : index
    %c0_18 = arith.constant 0 : index
    %c0_19 = arith.constant 0 : index
    %21 = vector.load %arg9[%c0_17, %c0_18, %c0_19] : memref<1x1x128xf32, #tpu.memory_space<vmem>>, vector<1x1x128xf32>
    %22 = vector.shape_cast %21 : vector<1x1x128xf32> to vector<1x128xf32>
    %23 = vector.shape_cast %20 : vector<1x128xf32> to vector<1x1x128xf32>
    tpu.vector_store %arg9[%c0_17, %c0_18, %c0_19], %23 {strides = array<i32>} : memref<1x1x128xf32, #tpu.memory_space<vmem>>, vector<1x1x128xf32>,
    return
  }
  func.func @transform_0(%arg0: i32, %arg1: i32) -> (i32, i32, i32) {
    %c0_i32 = arith.constant 0 : i32
    %c0_i32_0 = arith.constant 0 : i32
    return %arg0, %c0_i32, %arg1 : i32, i32, i32
  }
  func.func @transform_1(%arg0: i32, %arg1: i32) -> (i32, i32) {
    %c0_i32 = arith.constant 0 : i32
    %c0_i32_0 = arith.constant 0 : i32
    %c0_i32_1 = arith.constant 0 : i32
    return %c0_i32, %c0_i32_0 : i32, i32
  }
  func.func @transform_2(%arg0: i32, %arg1: i32) -> (i32, i32) {
    %c0_i32 = arith.constant 0 : i32
    %c0_i32_0 = arith.constant 0 : i32
    %c0_i32_1 = arith.constant 0 : i32
    return %c0_i32, %c0_i32_0 : i32, i32
  }
  func.func @transform_3(%arg0: i32, %arg1: i32) -> (i32, i32) {
    %c0_i32 = arith.constant 0 : i32
    %c0_i32_0 = arith.constant 0 : i32
    %c0_i32_1 = arith.constant 0 : i32
    return %c0_i32, %c0_i32_0 : i32, i32
  }
  func.func @transform_4(%arg0: i32, %arg1: i32) -> (i32, i32) {
    %c0_i32 = arith.constant 0 : i32
    %c0_i32_0 = arith.constant 0 : i32
    %c0_i32_1 = arith.constant 0 : i32
    return %c0_i32, %c0_i32_0 : i32, i32
  }
  func.func @transform_5(%arg0: i32, %arg1: i32) -> (i32, i32) {
    %c0_i32 = arith.constant 0 : i32
    %c0_i32_0 = arith.constant 0 : i32
    %c0_i32_1 = arith.constant 0 : i32
    return %c0_i32, %c0_i32_0 : i32, i32
  }
  func.func @transform_6(%arg0: i32, %arg1: i32) -> i32 {
    %c0_i32 = arith.constant 0 : i32
    %c0_i32_0 = arith.constant 0 : i32
    return %c0_i32 : i32
  }
  func.func @transform_7(%arg0: i32, %arg1: i32) -> (i32, i32, i32) {
    %c0_i32 = arith.constant 0 : i32
    %c0_i32_0 = arith.constant 0 : i32
    return %arg0, %c0_i32, %arg1 : i32, i32, i32
  }
}

</mosaic_0001>

<bundles_post_ra>
// kernel: tpu_custom_call.1
= control target key start
LH: loop header
LB: loop body
LE: loop exit
PB: predicated region body
PF: predicated region fallthrough
CT: control target
= control target key end

     0   :  { %s1377_s0 = inlined_call_operand.hbm [shape: f32[2,32,256], index: 0, kind: input, shape index: {}]   ;;  %s1378_s1 = inlined_call_operand.vmem [shape: f32[32,32], index: 1, kind: input, shape index: {}]   ;;  %s1379_s2 = inlined_call_operand.vmem [shape: f32[32,1], index: 2, kind: input, shape index: {}]   ;;  %s1380_s3 = inlined_call_operand.vmem [shape: f32[32,32], index: 3, kind: input, shape index: {}]   ;;  %s1381_s4 = inlined_call_operand.vmem [shape: f32[32,1], index: 4, kind: input, shape index: {}]   ;;  %s1382_s5 = inlined_call_operand.vmem [shape: f32[1,32], index: 5, kind: input, shape index: {}]   ;;  %s1383_s6 = inlined_call_operand.<no memory space> [shape: f32[1], index: 6, kind: input, shape index: {}]   ;;  %s1384_s7 = inlined_call_operand.hbm [shape: f32[2,1,256], index: 7, kind: output, shape index: {}]  }
   0x1   :  { %1390 = sst [smem:[#allocation12_spill]] %s1384_s7 }
   0x2   :  { %12 = sst [smem:[#allocation2]] %s1383_s6 }
   0x3   :  { %13 = vsyncpa [#allocation4], 0 }
   0x4   :  { %15 = vsyncpa [#allocation4 + $0x1], 0 }
   0x5   :  { %16 = vsyncpa [#allocation5], 0 }
   0x6   :  { %18 = vsyncpa [#allocation5 + $0x1], 0  ;;  %s1123_s26 = smov 0   ;;  %s1125_s27 = smov 0  }
   0x7   :  { %s1127_s28 = smov 0   ;;  %s1129_s29 = smov 0  }
   0x8   :  { %s1131_s30 = smov 0   ;;  %s1133_s8 = smov 0  }
   0x9   :  { %s1135_s9 = smov 0   ;;  %s1137_s10 = smov 0  }
   0xa LB: > { %1391 = sst [smem:[#allocation9_spill]] %s1041_s26  ;;  %s750_s6 = sadd.s32 4294967295, %s1069_s10   ;;  %s1069_s10 = sphi %s1137_s10, %s24_s10   ;;  %s1065_s9 = sphi %s1135_s9, %s1412_s9   ;;  %s1061_s8 = sphi %s1133_s8, %s1411_s8   ;;  %s1057_s30 = sphi %s1131_s30, %s1410_s30   ;;  %s1053_s29 = sphi %s1129_s29, %s1409_s29   ;;  %s1049_s28 = sphi %s1127_s28, %s1408_s28   ;;  %s1045_s27 = sphi %s1125_s27, %s1407_s27   ;;  %s1041_s26 = sphi %s1123_s26, %s1406_s26  }
   0xb   : > { %s751_s11 = sadd.s32 4294967294, %s1069_s10   ;;  %s33_s12 = sadd.s32 1, %s1061_s8 }
   0xc   : > { %s36_s13 = sadd.s32 1, %s1065_s9  ;;  %p34_p0 = scmp.ge.s32.totalorder %s33_s12, 2 }
   0xd   : > { %s45_s14 = sadd.s32 1, %s1049_s28  ;;  %p52_p1 = scmp.ne.s32.totalorder %s1049_s28, %s1045_s27 }
   0xe   : > { %p53_p2 = scmp.eq.s32.totalorder %s1069_s10, 0  ;;  %s1414_s12 = smov (%p34_p0, %s33_s12), 0 }
   0xf   : > { %1392 = sst [smem:[#allocation10_spill]] %s1414_s12  ;;  %s1416_s13 = smov (!%p34_p0, %s36_s13), %s1065_s9 }
  0x10   : > { %s41_s15 = ssub.s32 %s1061_s8, %s1414_s12  ;;  %p1176_p3 = por %p53_p2, %p52_p1 }
  0x11   : > { %p38_p4 = scmp.ge.s32.totalorder %s1416_s13, 2  ;;  %p58_p5 = scmp.ne.s32.totalorder %s1045_s27, %s1041_s26 }
  0x12   : > { %p59_p6 = scmp.eq.s32.totalorder %s750_s6, 0  ;;  %p210_p7 = scmp.eq.s32.totalorder %s750_s6, 3 }
  0x13   : > { %s1418_s13 = smov (%p38_p4, %s1416_s13), 0  ;;  %p216_p10 = scmp.eq.s32.totalorder %s751_s11, 3 }
  0x14   : > { %1394 = sst [smem:[#allocation11_spill]] %s1418_s13  ;;  %p1184_p8 = por %p59_p6, %p58_p5 }
  0x15   : > { %p1188_p9 = por %p210_p7, %p52_p1  ;;  %s40_s19 = ssub.s32 %s1065_s9, %s1418_s13 }
  0x16   : > { %s42_s20 = sor.u32 %s41_s15, %s40_s19  ;;  %p1194_p12 = por %p216_p10, %p58_p5 }
  0x17   : > { %s1396_s18 = scalar_select %p1188_p9, 1, 0 }
  0x18   : > { %p43_p11 = scmp.eq.s32.totalorder %s42_s20, 0  ;;  %p866_p13 = scmp.lt.s32.totalorder %s1069_s10, 4 }
  0x19   : > { %s1397_s21 = scalar_select %p1194_p12, 1, 0 }
  0x1a   : > { %s254_s22 = sand.u32 1, %s1049_s28   ;;  %s755_s25 = sshll.u32 %s1065_s9, 3 }
  0x1b   : > { %s1201_s23 = scalar_select %p43_p11, %s1049_s28, %s45_s14  }
  0x1c   : > { %s754_s24 = sshll.u32 %s254_s22, 5  ;;  %s263_s6 = sadd.s32 %s1061_s8, %s755_s25 }
  0x1d   : > { %s258_s12 = scalar_lea.vmem [#allocation3], %s754_s24  ;;  %s756_s7 = sshll.u32 %s263_s6, 7 }
  0x1e   : > { %s266_s26 = sshll.u32 %s258_s12, 4  ;;  %s1210_s15 = scalar_lea.hbm %s1377_s0, %s756_s7  ;;  %s1205_s26 = int_to_ptr.vmem [resolvable:$true] %s266_s26 }
  0x1f   : > { %p1214_p0 = pnand %p866_p13, %p1176_p3  ;;  %s1218_s12 = scalar_lea.sflag [#allocation4], %s254_s22 }
  0x20   : > { %s941_s19 = scalar_lea.hbm %s1210_s15, 512  ;;  %s946_s16 = scalar_lea.hbm %s1377_s0, 2048 }
  0x21   : > { %p942_p1 = scmp.ne.s32.totalorder %s1210_s15, %s941_s19  ;;  %p943_p2 = pneg %p1214_p0 }
  0x22   : > { %p947_p3 = scmp.lt.u32.totalorder %s1210_s15, %s1377_s0  ;;  %p948_p6 = scmp.lt.u32.totalorder %s946_s16, %s941_s19 }
  0x23   : > { %p944_p4 = pnand %p943_p2, %p942_p1  ;;  %p950_p10 = scmp.lt.u32.totalorder %s941_s19, %s1210_s15 }
  0x24   : > { %p949_p7 = por %p948_p6, %p947_p3 }
  0x25   : > { %p945_p5 = pneg %p944_p4 }
  0x26   : > { %p951_p11 = por %p950_p10, %p949_p7 }
  0x28   : > { %p952_p13 = pnand %p951_p11, %p945_p5 }
  0x2a   : > { %955 = shalt.err (!%p952_p13)
}
  0x2b   : > { %s956_s22 = scalar_lea.vmem %s1205_s26, 512  ;;  %s1071_s25 = smov [#allocation3]  }
  0x2c   : > { %p957_p1 = scmp.ne.s32.totalorder %s1205_s26, %s956_s22  ;;  %s961_s6 = sshll.u32 %s1071_s25, 4  ;;  %s962_s6 = int_to_ptr.vmem [resolvable:$false] %s961_s6 }
  0x2d   : > { %s963_s11 = scalar_lea.vmem %s962_s6, 1024  ;;  %p964_p9 = scmp.lt.s32.totalorder %s1205_s26, %s962_s6 }
  0x2e   : > { %p959_p4 = pnand %p957_p1, %p943_p2  ;;  %p965_p3 = scmp.lt.s32.totalorder %s963_s11, %s956_s22 }
  0x30   : > { %p960_p12 = pneg %p959_p4  ;;  %p966_p6 = por %p965_p3, %p964_p9 }
  0x32   : > { %p967_p7 = pnand %p966_p6, %p960_p12 }
  0x34   : > { %970 = shalt.err (!%p967_p7)
}
  0x35   : > { %s1072_s19 = smov 256   ;;  %s1073_s7 = smov 128  }
  0x36   : > { %s1074_s13 = smov 8   ;;  %p757_p2 = scmp.ge.s32.totalorder %s1069_s10, 1 }
  0x37   : > { %861 = dma.hbm_to_vmem [thread:$0]  (!%p1214_p0), %s1210_s15, 512, %s1205_s26, %s1218_s12, %s1072_s19, %s1073_s7, %s1074_s13  }
  0x38   : > { %p274_p5 = scmp.lt.s32.totalorder %s1069_s10, 5 }
  0x3a   : > { %p275_p10 = pnand %p757_p2, %p274_p5 }
  0x3b   : > { %s1249_s16 = sand.u32 (!%p275_p10), 1, %s1045_s27  }
  0x3c   : > { %278 = sbr.rel (%p275_p10) target bundleno = 760 (0x2f8), region = 48  ;;  %s758_s20 = sshll.u32 (!%p275_p10), %s1249_s16, 5 }
  0x3d   : > { %s281_s24 = scalar_lea.sflag (!%p275_p10), [#allocation4], %s1249_s16  ;;  %s284_s22 = scalar_lea.vmem (!%p275_p10), [#allocation3], %s758_s20 }
  0x43   : > { %1032 = dma.done.wait (%p1184_p8), %s281_s24, 512  }
  0x44   : > { %1034 = vsyncadd (%p1184_p8), %s281_s24, 4294966784  ;;  %v1075_v0 = vmov 0   ;;  %vm346_vm0 = vcmask 261120   ;;  %v314_v1 = vld [vmem:[%s284_s22] sm:$0xff]  ;;  %v315_v2 = vld [vmem:[%s284_s22 + $0x8] sm:$0xff]  ;;  %v1076_v41 = vmov 0.0|0.0  }
  0x45   : > { %939 = vset.pattern.permute.xlu0 %v1075_v0  ;;  %940 = vset.pattern.permute.xlu1 %v1075_v0  ;;  %v316_v3 = vld [vmem:[%s284_s22 + $0x10] sm:$0xff]  ;;  %v832_v4 = vpack.c.bf16 %v315_v2, %v314_v1  ;;  %v317_v5 = vld [vmem:[%s284_s22 + $0x18] sm:$0xff]  ;;  %v318_v6 = vld [vmem:[%s1378_s1] sm:$0xff]  ;;  %vm1077_vm1 = vmmov 0   ;;  %v1078_v42 = vmov 0.0   ;;  %s578_s6 = sld [smem:[#allocation2]] }
  0x46   : > { %v836_v7 = vpack.c.bf16 %v317_v5, %v316_v3  ;;  %801 = vmatprep.mubr.msk.f32.mxu0 %vm346_vm0, %v318_v6  ;;  %v322_v8 = vld [vmem:[%s1379_s2] sm:$0xff]  ;;  %v324_v9 = vld [vmem:[%s1379_s2 + $0x10] sm:$0xff]  ;;  %v323_v10 = vld [vmem:[%s1379_s2 + $0x8] sm:$0xff]  ;;  %s768_s11 = sshll.u32 %s1057_s30, 1  ;;  %s313_s13 = scalar_lea.vmem [#allocation6], %s1249_s16 }
  0x47   : > { %833 = vmatprep.subr.bf16.mxu0 %v832_v4  ;;  %328 = vperm.xlu0 %939, %v322_v8   ;;  %v325_v11 = vld [vmem:[%s1379_s2 + $0x18] sm:$0xff]  ;;  %v319_v12 = vld [vmem:[%s1378_s1 + $0x8] sm:$0xff]  ;;  %v452_v13 = vld [vmem:[%s1381_s4] sm:$0xff]  ;;  %s665_s19 = sadd.s32 %s1053_s29, %s768_s11  ;;  %s669_s20 = sshll.u32 %s313_s13, 4  ;;  %s1325_s20 = int_to_ptr.vmem [resolvable:$true] %s669_s20 }
  0x48   : > { %835 = vmatpush3.bf16.msra.mxu0 %v832_v4  ;;  %338 = vperm.xlu1 %940, %v324_v9   ;;  %v320_v14 = vld [vmem:[%s1378_s1 + $0x10] sm:$0xff]  ;;  %v453_v15 = vld [vmem:[%s1381_s4 + $0x8] sm:$0xff]  ;;  %v321_v16 = vld [vmem:[%s1378_s1 + $0x18] sm:$0xff]  ;;  %s769_s7 = sshll.u32 %s665_s19, 4  ;;  %s1399_s26 = sld [smem:[#allocation12_spill]] }
  0x49   : > { %837 = vmatprep.subr.bf16.mxu0 %v836_v7  ;;  %v454_v17 = vld [vmem:[%s1381_s4 + $0x10] sm:$0xff]  ;;  %v455_v18 = vld [vmem:[%s1381_s4 + $0x18] sm:$0xff]  ;;  %v448_v19 = vld [vmem:[%s1380_s3] sm:$0xff]  ;;  %s655_s30 = scalar_lea.sflag [#allocation5], %s1249_s16  ;;  %s971_s29 = scalar_lea.vmem %s1325_s20, 16 }
  0x4a   : > { %815 = vmatprep.mubr.msk.f32.mxu1 %vm346_vm0, %v448_v19  ;;  %v449_v38 = vld [vmem:[%s1380_s3 + $0x8] sm:$0xff]  ;;  %v450_v39 = vld [vmem:[%s1380_s3 + $0x10] sm:$0xff]  ;;  %v451_v40 = vld [vmem:[%s1380_s3 + $0x18] sm:$0xff]  ;;  %p972_p8 = scmp.ne.s32.totalorder %s1325_s20, %s971_s29  ;;  %p1401_p9 = scmp.ne.s32.totalorder %s1396_s18, 0 }
  0x4b   : > { %333 = vperm.xlu0 %939, %v323_v10   ;;  %v577_v61 = vld [vmem:[%s1382_s5] sm:$0x1]  ;;  %v579_v62 = vstv %s578_s6  ;;  %s1079_s12 = smov [#allocation6]  }
  0x4c   : > { %839 = vmatpush3.bf16.msra.mxu0 %v836_v7  ;;  %343 = vperm.xlu1 %940, %v325_v11   ;;  %p973_p12 = pnand %p972_p8, %p1401_p9  ;;  %s975_s17 = sshll.u32 %s1079_s12, 4  ;;  %s976_s17 = int_to_ptr.vmem [resolvable:$false] %s975_s17 }
  0x4d   : > { %848 = vmatprep.subr.bf16.mxu0 %v1076_v41  ;;  %s977_s25 = scalar_lea.vmem %s976_s17, 32  ;;  %p978_p11 = scmp.lt.s32.totalorder %s1325_s20, %s976_s17 }
  0x4e   : > { %s1400_s15 = smov %s1399_s26  ;;  %s1323_s14 = scalar_lea.hbm %s1399_s26, %s769_s7 }
  0x4f   : > { %802 = vmatmul.mubr.msk.f32.vlgmr.msra.gmra.mrb[0].mxu0 %vm346_vm0, %v319_v12  ;;  %458 = vperm.xlu0 %939, %v452_v13   ;;  %p974_p0 = pneg %p973_p12  ;;  %p979_p13 = scmp.lt.s32.totalorder %s977_s25, %s971_s29 }
  0x50   : > { %804 = vmatprep.mubr.msk.f32.mxu0 %vm346_vm0, %v320_v14  ;;  %463 = vperm.xlu1 %940, %v453_v15  }
  0x51   : > { %p980_p1 = por %p979_p13, %p978_p11 }
  0x53   : > { %805 = vmatmul.mubr.msk.f32.gmra.mrb[2].mxu0 %vm346_vm0, %v321_v16  ;;  %468 = vperm.xlu0 %939, %v454_v17   ;;  %p981_p4 = pnand %p980_p1, %p974_p0 }
  0x54   : > { %473 = vperm.xlu1 %940, %v455_v18   ;;  %829 = vmatprep.mubr.msk.f32.mxu0 %vm1077_vm1, %v1078_v42 }
  0xc6   : > { %v329_v20 = vpop.permute.xlu0 %328 }
  0xc7   : > { %v339_v21 = vpop.permute.xlu1 %338 }
  0xca   : > { %v334_v22 = vpop.permute.xlu0 %333 }
  0xcb   : > { %v344_v28 = vpop.permute.xlu1 %343 }
  0xce   : > { %v459_v44 = vpop.permute.xlu0 %458 }
  0xcf   : > { %v464_v43 = vpop.permute.xlu1 %463 }
  0xd2   : > { %v469_v53 = vpop.permute.xlu0 %468 }
  0xd3   : > { %v474_v50 = vpop.permute.xlu1 %473 }
 0x122   : > { %v803_v23 = vpop.f32.mrb[0].mxu0 }
 0x123   : > { %v431_v24 = vadd.f32 %v803_v23, %v334_v22  ;;  %v425_v25 = vpop.f32.mrb[1].mxu0 }
 0x124   : > { %v426_v26 = vadd.f32 %v425_v25, %v329_v20 }
 0x125   : > { %v445_v27 = vmax.f32 %v431_v24, 0.0 }
 0x126   : > { %v444_v29 = vmax.f32 %v426_v26, 0.0  ;;  %v806_v30 = vpop.f32.mrb[2].mxu0 }
 0x127   : > { %v441_v31 = vadd.f32 %v806_v30, %v344_v28  ;;  %v435_v32 = vpop.f32.mrb[3].mxu0 }
 0x128   : > { %v436_v33 = vadd.f32 %v435_v32, %v339_v21  ;;  %v840_v34 = vpack.c.bf16 %v445_v27, %v444_v29 }
 0x129   : > { %v447_v35 = vmax.f32 %v441_v31, 0.0 }
 0x12a   : > { %v446_v36 = vmax.f32 %v436_v33, 0.0  ;;  %841 = vmatprep.subr.bf16.mxu1 %v840_v34 }
 0x12b   : > { %843 = vmatpush3.bf16.msra.mxu1 %v840_v34 }
 0x12c   : > { %v844_v37 = vpack.c.bf16 %v447_v35, %v446_v36 }
 0x12e   : > { %845 = vmatprep.subr.bf16.mxu1 %v844_v37 }
 0x12f   : > { %847 = vmatpush3.bf16.msra.mxu1 %v844_v37 }
 0x132   : > { %816 = vmatmul.mubr.msk.f32.vlgmr.msra.gmra.mrb[0].mxu1 %vm346_vm0, %v449_v38 }
 0x133   : > { %818 = vmatprep.mubr.msk.f32.mxu1 %vm346_vm0, %v450_v39 }
 0x136   : > { %819 = vmatmul.mubr.msk.f32.gmra.mrb[2].mxu1 %vm346_vm0, %v451_v40 }
 0x205   : > { %v817_v45 = vpop.f32.mrb[0].mxu1 }
 0x206   : > { %v560_v46 = vadd.f32 %v817_v45, %v464_v43  ;;  %v554_v47 = vpop.f32.mrb[1].mxu1 }
 0x207   : > { %v555_v48 = vadd.f32 %v554_v47, %v459_v44 }
 0x208   : > { %v574_v49 = vmax.f32 %v560_v46, 0.0 }
 0x209   : > { %v573_v51 = vmax.f32 %v555_v48, 0.0  ;;  %v820_v52 = vpop.f32.mrb[2].mxu1 }
 0x20a   : > { %v570_v54 = vadd.f32 %v820_v52, %v474_v50  ;;  %v564_v55 = vpop.f32.mrb[3].mxu1 }
 0x20b   : > { %v849_v56 = vpack.c.bf16 %v574_v49, %v573_v51  ;;  %v565_v57 = vadd.f32 %v564_v55, %v469_v53 }
 0x20c   : > { %v576_v58 = vmax.f32 %v570_v54, 0.0 }
 0x20d   : > { %v575_v59 = vmax.f32 %v565_v57, 0.0  ;;  %850 = vmatpush3.bf16.msra.mxu0 %v849_v56 }
 0x20e   : > { %851 = vmatprep.subr.bf16.mxu0 %v1076_v41 }
 0x20f   : > { %v852_v60 = vpack.c.bf16 %v576_v58, %v575_v59 }
 0x211   : > { %853 = vmatpush3.bf16.msra.mxu0 %v852_v60 }
 0x214   : > { %830 = vmatmul.mubr.msk.f32.vlgmr.msra.gmra.mrb[4].mxu0 %vm346_vm0, %v577_v61 }
 0x2e7   : > { %v649_v63 = vpop.f32.mrb[4].mxu0 }
 0x2e8   : > { %v650_v0 = vadd.f32 %v649_v63, %v579_v62  ;;  %v831_v1 = vpop.f32.mrb[5].mxu0 }
 0x2ea   : > { %653 = vst [vmem:[%s313_s13] sm:$0x1] %v650_v0 }
 0x2eb   : > { %984 = shalt.err (!%p981_p4)
}
 0x2ec   : > { %s985_s16 = scalar_lea.hbm %s1323_s14, 16  ;;  %s989_s19 = scalar_lea.hbm %s1400_s15, 64 }
 0x2ed   : > { %p986_p3 = scmp.ne.s32.totalorder %s1323_s14, %s985_s16  ;;  %p990_p2 = scmp.lt.u32.totalorder %s1323_s14, %s1400_s15 }
 0x2ee   : > { %p991_p5 = scmp.lt.u32.totalorder %s989_s19, %s985_s16  ;;  %p993_p8 = scmp.lt.u32.totalorder %s985_s16, %s1323_s14 }
 0x2ef   : > { %p987_p6 = pnand %p986_p3, %p1401_p9 }
 0x2f0   : > { %p992_p10 = por %p991_p5, %p990_p2 }
 0x2f1   : > { %p988_p7 = pneg %p987_p6 }
 0x2f2   : > { %p994_p12 = por %p993_p8, %p992_p10 }
 0x2f4   : > { %p995_p0 = pnand %p994_p12, %p988_p7 }
 0x2f6   : > { %998 = shalt.err (!%p995_p0)
}
 0x2f7   : > { %856 = dma.vmem_to_hbm [thread:$0]  (%p1401_p9), %s1325_s20, 16, %s1323_s14, %s655_s30  }
 0x2f8 PF: > { %s1402_s24 = sld [smem:[#allocation9_spill]]  ;;  %p867_p11 = scmp.ge.s32.totalorder %s1069_s10, 2 }
 0x2f9   : > { %p1403_p13 = scmp.ne.s32.totalorder %s1397_s21, 0 }
 0x2fb   : > { %p863_p1 = pnand %p867_p11, %p1403_p13 }
 0x2fe   : > { %s681_s22 = sand.u32 1, %s1402_s24  }
 0x2ff   : > { %s682_s26 = scalar_lea.sflag [#allocation5], %s681_s22 }
 0x300   : > { %1036 = dma.done.wait (!%p863_p1), %s682_s26, 16  }
 0x301   : > { %1038 = vsyncadd (!%p863_p1), %s682_s26, 4294967280  ;;  %s24_s10 = sadd.s32 1, %s1069_s10   ;;  %s1404_s18 = sld [smem:[#allocation10_spill]] }
 0x302   : > { %p21_p4 = scmp.ge.s32.totalorder %s24_s10, 6   ;;  %s1405_s20 = sld [smem:[#allocation11_spill]] }
 0x303   : > { %s1406_s26 = smov %s1045_s27  ;;  %s1407_s27 = smov %s1049_s28 }
 0x304   : > { %s1408_s28 = smov %s1201_s23  ;;  %s1409_s29 = smov %s1061_s8 }
 0x305   : > { %s1410_s30 = smov %s1065_s9  ;;  %23 = sbr.rel (!%p21_p4) target bundleno = 10 (0xa), region = 93 }
 0x307   : > { %s1411_s8 = smov %s1404_s18 }
 0x308   : > { %s1412_s9 = smov %s1405_s20 }
 0x30c   :  { %686 = vsyncpa [#allocation4], 1 }
 0x30d   :  { %688 = vsyncpa [#allocation4 + $0x1], 1 }
 0x30e   :  { %689 = vsyncpa [#allocation5], 1 }
 0x30f   :  { %691 = vsyncpa [#allocation5 + $0x1], 1 }

</bundles_post_ra>
